<compile_context>
chip_gen: v7x
topology: tpu7x:2x2x1
jax: 0.10.0
libtpu: 0.0.40
codegen_flags: <defaults>
</compile_context>

<pallas_src>
import jax
import jax.numpy as jnp
import numpy as np
from jax.experimental import pallas as pl
from jax.experimental.pallas import tpu as pltpu  # noqa: F401  (TPU backend)

LANE = 128
SUBLANE = 8


def _round_up(x, m):
    return (x + m - 1) // m * m


# ------------------------------ Pallas kernel ------------------------------ #
def _fused_mod_kernel(g_ref, w_ref, b_ref, out_ref):
    # g_ref  : (S, Npad, ctx)  whole (padded) batch, S contraction dim first (S==1 typical)
    # w_ref  : (ctx, 2P)       [alpha cols | beta cols], expanded to flat outer layout
    # b_ref  : (1, 2P)         fused biases, same layout
    # out_ref: (Npad, P)       flattened modulation weights for ALL layers (lane-dense)
    S = g_ref.shape[0]
    P = out_ref.shape[-1]
    w = w_ref[...]
    b = b_ref[...]
    acc = None
    for s in range(S):  # static, unrolled; S == 1 in practice
        feat = jnp.dot(g_ref[s], w, preferred_element_type=jnp.float32) + b  # (Npad, 2P)
        prod = feat[:, :P] * feat[:, P:]          # rank-1 outer product on the VPU
        acc = prod if acc is None else acc + prod
    out_ref[...] = acc


def _fused_mod_call(g_snc, w_fused, b_fused, P):
    S, Npad, _ = g_snc.shape
    return pl.pallas_call(
        _fused_mod_kernel,
        out_shape=jax.ShapeDtypeStruct((Npad, P), jnp.float32),
        # grid-less: whole (tiny) working set lives in VMEM; single invocation,
        # no per-step overhead, no megacore split of sub-microsecond work.
    )(g_snc, w_fused, b_fused)


# -------------------- module definition / parameter packing ----------------- #
def build_layer_dims(in_chans, chans, num_pool_layers):
    """Returns list of (alpha_dim, beta_dim) in order: down..., latent, up... ."""
    dims = [(in_chans, chans)]
    ch = chans
    for _ in range(num_pool_layers - 1):
        dims.append((ch, ch * 2))
        ch *= 2
    dims.append((ch, ch))                       # latent
    for _ in range(num_pool_layers - 1):
        dims.append((ch * 2, ch // 2))
        ch //= 2
    dims.append((ch * 2, ch))
    return dims


def init_params(key, ctx, layer_dims):
    """One dict per layer: wa (A,ctx), ba (A,), wb (B,ctx), bb (B,) (nn.Linear-style)."""
    params = []
    bound = 1.0 / np.sqrt(ctx)
    for (a_dim, b_dim) in layer_dims:
        key, k1, k2, k3, k4 = jax.random.split(key, 5)
        params.append(dict(
            wa=jax.random.uniform(k1, (a_dim, ctx), jnp.float32, -bound, bound),
            ba=jax.random.uniform(k2, (a_dim,), jnp.float32, -bound, bound),
            wb=jax.random.uniform(k3, (b_dim, ctx), jnp.float32, -bound, bound),
            bb=jax.random.uniform(k4, (b_dim,), jnp.float32, -bound, bound),
        ))
    return params, key


def pack_params(params, ctx):
    """Expand every layer's weights into the flat outer-product layout.

    For layer l and flat position p = off_l + b*A_l + a:
      alpha column = wa_l[:, a]  (tile A cols B times)
      beta  column = wb_l[:, b]  (repeat each of B cols A times)
    so that  (g @ Wa_exp + ba_exp) * (g @ Wb_exp + bb_exp)  == beta^T @ alpha, flattened.
    """
    wa_cols, ba_cols, wb_cols, bb_cols = [], [], [], []
    layout = []
    off = 0
    for p in params:
        A = p["wa"].shape[0]
        B = p["wb"].shape[0]
        wa_t = jnp.asarray(p["wa"], jnp.float32).T           # (ctx, A)
        wb_t = jnp.asarray(p["wb"], jnp.float32).T           # (ctx, B)
        wa_cols.append(jnp.tile(wa_t, (1, B)))                # (ctx, B*A)
        ba_cols.append(jnp.tile(jnp.asarray(p["ba"], jnp.float32), (B,)))
        wb_cols.append(jnp.repeat(wb_t, A, axis=1))            # (ctx, B*A)
        bb_cols.append(jnp.repeat(jnp.asarray(p["bb"], jnp.float32), A))
        layout.append((off, B, A))
        off += B * A
    total = off
    P = _round_up(total, LANE)                                  # lane-dense slab width
    pad = P - total
    wa_exp = jnp.concatenate(wa_cols, axis=1)
    wb_exp = jnp.concatenate(wb_cols, axis=1)
    ba_exp = jnp.concatenate(ba_cols)
    bb_exp = jnp.concatenate(bb_cols)
    if pad:
        wa_exp = jnp.pad(wa_exp, ((0, 0), (0, pad)))
        wb_exp = jnp.pad(wb_exp, ((0, 0), (0, pad)))
        ba_exp = jnp.pad(ba_exp, (0, pad))
        bb_exp = jnp.pad(bb_exp, (0, pad))
    w_fused = jnp.concatenate([wa_exp, wb_exp], axis=1)         # (ctx, 2P)
    b_fused = jnp.concatenate([ba_exp, bb_exp]).reshape(1, 2 * P)
    return w_fused, b_fused, P, tuple(layout)


def make_forward(layout, P, num_pool_layers):
    """Jitted forward: one pallas_call + 7 lane-aligned slices (no per-batch loop)."""
    @jax.jit
    def forward(gamma_val, w_fused, b_fused):
        gamma_val = jnp.asarray(gamma_val, jnp.float32)
        N, S, C = gamma_val.shape
        # Pad the batch (sublane) dim to a multiple of 8 -> unmasked kernel stores.
        Npad = _round_up(max(N, 1), SUBLANE)
        g = gamma_val
        if Npad != N:
            g = jnp.pad(g, ((0, Npad - N), (0, 0), (0, 0)))
        g_snc = jnp.transpose(g, (1, 0, 2))                      # (S, Npad, ctx)
        slab = _fused_mod_call(g_snc, w_fused, b_fused, P)[:N]   # (N, P)

        def extract(off, B, A):
            return slab[:, off:off + B * A].reshape(N, B, A, 1, 1)

        outs = [extract(*e) for e in layout]
        down = outs[:num_pool_layers]
        latent = outs[num_pool_layers]
        up = outs[num_pool_layers + 1:]
        return down, latent, up
    return forward


def nested_view(down, latent, up):
    """Optional compatibility shim reproducing the PyTorch nested-list structure
    (list over batch of lists over layers). Not part of the hot path."""
    N = latent.shape[0]
    down_b = [[d[n] for d in down] for n in range(N)]
    latent_b = [latent[n] for n in range(N)]
    up_b = [[u[n] for u in up] for n in range(N)]
    return down_b, latent_b, up_b


# ------------------------------ reference (JAX) ----------------------------- #
def _ref_mod_weight(g, wa, ba, wb, bb):
    alpha = g @ wa.T + ba     # (N, S, A)
    beta = g @ wb.T + bb      # (N, S, B)
    return jnp.einsum("nsb,nsa->nba", beta, alpha)


# ----------------------------------- main ----------------------------------- #
if __name__ == "__main__":
    # Small config consistent with the module.
    contextvectorsize = 8
    in_chans = 2
    out_chans = 2          # unused by forward (as in the PyTorch module)
    chans = 8
    num_pool_layers = 3
    batch = 2
    S = 1                  # gamma_val[n] is (S, ctx)

    layer_dims = build_layer_dims(in_chans, chans, num_pool_layers)

    key = jax.random.PRNGKey(0)
    params, key = init_params(key, contextvectorsize, layer_dims)
    w_fused, b_fused, P, layout = pack_params(params, contextvectorsize)

    key, gk = jax.random.split(key)
    gamma_val = jax.random.normal(gk, (batch, S, contextvectorsize), jnp.float32)

    forward = make_forward(layout, P, num_pool_layers)
    down_out, latent_out, up_out = forward(gamma_val, w_fused, b_fused)
    jax.block_until_ready(jax.tree_util.tree_leaves((down_out, latent_out, up_out)))

    # Correctness check against a pure-JAX reference (per layer, stacked batch).
    stacked = down_out + [latent_out] + up_out
    ok = True
    for lyr, p in zip(stacked, params):
        ref = _ref_mod_weight(gamma_val, p["wa"], p["ba"], p["wb"], p["bb"])
        ok &= bool(np.allclose(np.asarray(lyr[:, :, :, 0, 0]), np.asarray(ref),
                               rtol=1e-5, atol=1e-5))
    assert ok, "Pallas output mismatch vs JAX reference"

    # Demonstrate the PyTorch-style nested structure once (lazy view, off hot path).
    d_b, l_b, u_b = nested_view(down_out, latent_out, up_out)
    assert len(d_b) == batch and len(d_b[0]) == num_pool_layers
    assert l_b[0].shape == (chans * 2 ** (num_pool_layers - 1),
                            chans * 2 ** (num_pool_layers - 1), 1, 1)

    print("KERNEL_OK")
</pallas_src>

<mosaic_0001>
module attributes {stable_mosaic.version = 11 : i64} {
  func.func @_fused_mod_kernel(%arg0: memref<1x8x8xf32, #tpu.memory_space<vmem>>, %arg1: memref<8x6400xf32, #tpu.memory_space<vmem>>, %arg2: memref<1x6400xf32, #tpu.memory_space<vmem>>, %arg3: memref<8x3200xf32, #tpu.memory_space<vmem>>) attributes {dimension_semantics = [], scalar_prefetch = 0 : i64, scratch_operands = 0 : i64, tpu.core_type = #tpu.core_type<tc>} {
    %c0 = arith.constant 0 : index
    %c0_0 = arith.constant 0 : index
    %0 = vector.load %arg1[%c0, %c0_0] : memref<8x6400xf32, #tpu.memory_space<vmem>>, vector<8x6400xf32>
    %c0_1 = arith.constant 0 : index
    %c0_2 = arith.constant 0 : index
    %1 = vector.load %arg2[%c0_1, %c0_2] : memref<1x6400xf32, #tpu.memory_space<vmem>>, vector<1x6400xf32>
    %c0_3 = arith.constant 0 : index
    %c0_4 = arith.constant 0 : index
    %c0_5 = arith.constant 0 : index
    %2 = vector.load %arg0[%c0_3, %c0_4, %c0_5] : memref<1x8x8xf32, #tpu.memory_space<vmem>>, vector<1x8x8xf32>
    %3 = vector.shape_cast %2 : vector<1x8x8xf32> to vector<8x8xf32>
    %cst = arith.constant dense<0.000000e+00> : vector<8x6400xf32>
    %4 = tpu.matmul %3, %0, %cst {dimension_numbers = #tpu.dot_dimension_numbers<[1], [0], [0], [1], [0, 0, 1, 1], [], []>} : vector<8x8xf32>, vector<8x6400xf32>, vector<8x6400xf32> -> vector<8x6400xf32>
    %5 = vector.broadcast %1 : vector<1x6400xf32> to vector<8x6400xf32>
    %6 = arith.addf %4, %5 : vector<8x6400xf32>
    %7 = vector.extract_strided_slice %6 {offsets = [0, 0], sizes = [8, 3200], strides = [1, 1]} : vector<8x6400xf32> to vector<8x3200xf32>
    %8 = vector.extract_strided_slice %6 {offsets = [0, 3200], sizes = [8, 3200], strides = [1, 1]} : vector<8x6400xf32> to vector<8x3200xf32>
    %9 = arith.mulf %7, %8 : vector<8x3200xf32>
    %c0_6 = arith.constant 0 : index
    %c0_7 = arith.constant 0 : index
    %10 = vector.load %arg3[%c0_6, %c0_7] : memref<8x3200xf32, #tpu.memory_space<vmem>>, vector<8x3200xf32>
    tpu.vector_store %arg3[%c0_6, %c0_7], %9 {strides = array<i32>} : memref<8x3200xf32, #tpu.memory_space<vmem>>, vector<8x3200xf32>,
    return
  }
}

</mosaic_0001>

<bundles_post_ra>
// kernel: forward.1
= control target key start
LH: loop header
LB: loop body
LE: loop exit
PB: predicated region body
PF: predicated region fallthrough
CT: control target
= control target key end

     0   :  { %8 = vsyncpa [#allocation3], 0  ;;  %s2715_s0 = inlined_call_operand.vmem [shape: f32[1,8,8], index: 0, kind: input, shape index: {}]   ;;  %s2716_s1 = inlined_call_operand.hbm [shape: f32[8,6400], index: 1, kind: input, shape index: {}]   ;;  %s2717_s2 = inlined_call_operand.hbm [shape: f32[1,6400], index: 2, kind: input, shape index: {}]   ;;  %s2718_s3 = inlined_call_operand.vmem [shape: f32[8,3200], index: 3, kind: output, shape index: {}]  }
   0x1   :  { %9 = vsyncpa [#allocation5], 0  ;;  %s2264_s12 = smov [#allocation2]   ;;  %s2265_s14 = smov [#allocation4]  }
   0x2   :  { %s18_s13 = sshll.u32 %s2264_s12, 4  ;;  %s28_s15 = sshll.u32 %s2265_s14, 4  ;;  %s19_s13 = int_to_ptr.vmem [resolvable:$true] %s18_s13  ;;  %s29_s15 = int_to_ptr.vmem [resolvable:$true] %s28_s15 }
   0x3   :  { %s2216_s18 = scalar_lea.hbm %s2716_s1, 6400 }
   0x4   :  { %p2217_p0 = scmp.ne.s32.totalorder %s2716_s1, %s2216_s18  ;;  %p2220_p1 = scmp.lt.u32.totalorder %s2216_s18, %s2716_s1 }
   0x6   :  { %p2222_p2 = pnand %p2220_p1, %p2217_p0 }
   0x8   :  { %2225 = shalt.err (!%p2222_p2)
}
   0x9   :  { %s2226_s23 = scalar_lea.vmem %s19_s13, 6400  ;;  %p2231_p4 = scmp.lt.s32.totalorder %s19_s13, %s19_s13 }
   0xa   :  { %p2227_p3 = scmp.ne.s32.totalorder %s19_s13, %s2226_s23  ;;  %p2232_p5 = scmp.lt.s32.totalorder %s2226_s23, %s2226_s23 }
   0xc   :  { %p2233_p6 = por %p2232_p5, %p2231_p4 }
   0xe   :  { %p2234_p7 = pnand %p2233_p6, %p2227_p3 }
  0x10   :  { %2237 = shalt.err (!%p2234_p7)
}
  0x11   :  { %21 = dma.hbm_to_vmem [thread:$0]  %s2716_s1, 6400, %s19_s13, [#allocation3]  }
  0x12   :  { %s2238_s28 = scalar_lea.hbm %s2717_s2, 800 }
  0x13   :  { %p2239_p8 = scmp.ne.s32.totalorder %s2717_s2, %s2238_s28  ;;  %p2242_p9 = scmp.lt.u32.totalorder %s2238_s28, %s2717_s2 }
  0x15   :  { %p2244_p10 = pnand %p2242_p9, %p2239_p8 }
  0x17   :  { %2247 = shalt.err (!%p2244_p10)
}
  0x18   :  { %s2248_s6 = scalar_lea.vmem %s29_s15, 800  ;;  %p2253_p12 = scmp.lt.s32.totalorder %s29_s15, %s29_s15 }
  0x19   :  { %p2249_p11 = scmp.ne.s32.totalorder %s29_s15, %s2248_s6  ;;  %p2254_p13 = scmp.lt.s32.totalorder %s2248_s6, %s2248_s6 }
  0x1b   :  { %p2255_p0 = por %p2254_p13, %p2253_p12 }
  0x1d   :  { %p2256_p1 = pnand %p2255_p0, %p2249_p11 }
  0x1f   :  { %2259 = shalt.err (!%p2256_p1)
}
  0x20   :  { %31 = dma.hbm_to_vmem [thread:$0]  %s2717_s2, 800, %s29_s15, [#allocation5]  }
  0x21   :  { %2260 = dma.done.wait [#allocation3], 6400  }
  0x22   :  { %2261 = vsyncadd [#allocation3], 4294960896 }
  0x23   :  { %2262 = dma.done.wait [#allocation5], 800  }
  0x24   :  { %2263 = vsyncadd [#allocation5], 4294966496  ;;  %v2266_v0 = vmov 0.0   ;;  %v39_v1 = vld [vmem:[#allocation2 + $0x8] sm:$0xff]  ;;  %v41_v2 = vld [vmem:[#allocation2 + $0x18] sm:$0xff]  ;;  %vm353_vm0 = vcmask 64512   ;;  %v103_v60 = vlaneseq }
  0x25   :  { %421 = vmatprep.mubr.f32.mxu0 %v2266_v0  ;;  %492 = vmatprep.mubr.f32.mxu1 %v2266_v0  ;;  %v38_v3 = vld [vmem:[#allocation2] sm:$0xff]  ;;  %v40_v4 = vld [vmem:[#allocation2 + $0x10] sm:$0xff]  ;;  %v43_v6 = vld [vmem:[#allocation2 + $0x28] sm:$0xff] }
  0x26   :  { %357 = vmatprep.subr.mxu0 %v39_v1  ;;  %428 = vmatprep.subr.mxu1 %v41_v2  ;;  %v2316_v5 = vld [vmem:[%s2715_s0] sm:$0xff]  ;;  %v45_v8 = vld [vmem:[#allocation2 + $0x38] sm:$0xff]  ;;  %v44_v9 = vld [vmem:[#allocation2 + $0x30] sm:$0xff]  ;;  %v104_v1 = vshrl.u32 %v103_v60, 7 }
  0x27   :  { %358 = vmatpush1.msra.mxu0 %v38_v3  ;;  %429 = vmatpush1.msra.mxu1 %v40_v4  ;;  %v42_v7 = vld [vmem:[#allocation2 + $0x20] sm:$0xff]  ;;  %v47_v10 = vld [vmem:[#allocation2 + $0x48] sm:$0xff]  ;;  %v49_v11 = vld [vmem:[#allocation2 + $0x58] sm:$0xff] }
  0x28   :  { %2188 = vmatmul.mubr.msk.f32.vlgmr.msra.gmra.mrb[0].mxu0 %vm353_vm0, %v2316_v5  ;;  %2189 = vmatmul.mubr.msk.f32.vlgmr.msra.gmra.mrb[0].mxu1 %vm353_vm0, %v2316_v5  ;;  %v46_v12 = vld [vmem:[#allocation2 + $0x40] sm:$0xff]  ;;  %v48_v13 = vld [vmem:[#allocation2 + $0x50] sm:$0xff]  ;;  %v51_v14 = vld [vmem:[#allocation2 + $0x68] sm:$0xff] }
  0x29   :  { %499 = vmatprep.subr.mxu0 %v43_v6  ;;  %570 = vmatprep.subr.mxu1 %v45_v8  ;;  %v53_v15 = vld [vmem:[#allocation2 + $0x78] sm:$0xff]  ;;  %v50_v16 = vld [vmem:[#allocation2 + $0x60] sm:$0xff]  ;;  %v52_v17 = vld [vmem:[#allocation2 + $0x70] sm:$0xff]  ;;  %v2423_v6 = vsub.s32 0, %v104_v1  ;;  %v2427_v8 = vsub.s32 2, %v104_v1 }
  0x2a   :  { %500 = vmatpush1.msra.mxu0 %v42_v7  ;;  %563 = vmatprep.mubr.f32.mxu0 %v2266_v0  ;;  %v55_v18 = vld [vmem:[#allocation2 + $0x88] sm:$0xff]  ;;  %v57_v19 = vld [vmem:[#allocation2 + $0x98] sm:$0xff]  ;;  %v54_v20 = vld [vmem:[#allocation2 + $0x80] sm:$0xff]  ;;  %v2425_v7 = vsub.s32 1, %v104_v1 }
  0x2b   :  { %571 = vmatpush1.msra.mxu1 %v44_v9  ;;  %634 = vmatprep.mubr.f32.mxu1 %v2266_v0  ;;  %v56_v21 = vld [vmem:[#allocation2 + $0x90] sm:$0xff]  ;;  %v59_v22 = vld [vmem:[#allocation2 + $0xa8] sm:$0xff]  ;;  %v61_v23 = vld [vmem:[#allocation2 + $0xb8] sm:$0xff] }
  0x2c   :  { %2190 = vmatmul.mubr.msk.f32.vlgmr.msra.gmra.mrb[2].mxu0 %vm353_vm0, %v2316_v5  ;;  %2191 = vmatmul.mubr.msk.f32.vlgmr.msra.gmra.mrb[2].mxu1 %vm353_vm0, %v2316_v5  ;;  %v58_v24 = vld [vmem:[#allocation2 + $0xa0] sm:$0xff]  ;;  %v60_v25 = vld [vmem:[#allocation2 + $0xb0] sm:$0xff]  ;;  %v63_v26 = vld [vmem:[#allocation2 + $0xc8] sm:$0xff] }
  0x2d   :  { %641 = vmatprep.subr.mxu0 %v47_v10  ;;  %712 = vmatprep.subr.mxu1 %v49_v11  ;;  %v65_v27 = vld [vmem:[#allocation2 + $0xd8] sm:$0xff]  ;;  %v62_v28 = vld [vmem:[#allocation2 + $0xc0] sm:$0xff]  ;;  %v64_v29 = vld [vmem:[#allocation2 + $0xd0] sm:$0xff]  ;;  %v2431_v10 = vsub.s32 4, %v104_v1  ;;  %v2433_v11 = vsub.s32 3, %v104_v1 }
  0x2e   :  { %642 = vmatpush1.msra.mxu0 %v46_v12  ;;  %705 = vmatprep.mubr.f32.mxu0 %v2266_v0  ;;  %v67_v30 = vld [vmem:[#allocation2 + $0xe8] sm:$0xff]  ;;  %v69_v31 = vld [vmem:[#allocation2 + $0xf8] sm:$0xff]  ;;  %v66_v32 = vld [vmem:[#allocation2 + $0xe0] sm:$0xff]  ;;  %v2435_v12 = vsub.s32 5, %v104_v1 }
  0x2f   :  { %713 = vmatpush1.msra.mxu1 %v48_v13  ;;  %776 = vmatprep.mubr.f32.mxu1 %v2266_v0  ;;  %v68_v33 = vld [vmem:[#allocation2 + $0xf0] sm:$0xff]  ;;  %v71_v34 = vld [vmem:[#allocation2 + $0x108] sm:$0xff]  ;;  %v73_v35 = vld [vmem:[#allocation2 + $0x118] sm:$0xff]  ;;  %v2437_v13 = vsub.s32 6, %v104_v1 }
  0x30   :  { %2192 = vmatmul.mubr.msk.f32.vlgmr.msra.gmra.mrb[4].mxu0 %vm353_vm0, %v2316_v5  ;;  %2193 = vmatmul.mubr.msk.f32.vlgmr.msra.gmra.mrb[4].mxu1 %vm353_vm0, %v2316_v5  ;;  %v70_v36 = vld [vmem:[#allocation2 + $0x100] sm:$0xff]  ;;  %v72_v37 = vld [vmem:[#allocation2 + $0x110] sm:$0xff]  ;;  %v75_v38 = vld [vmem:[#allocation2 + $0x128] sm:$0xff] }
  0x31   :  { %783 = vmatprep.subr.mxu0 %v51_v14  ;;  %854 = vmatprep.subr.mxu1 %v53_v15  ;;  %v77_v39 = vld [vmem:[#allocation2 + $0x138] sm:$0xff]  ;;  %v74_v40 = vld [vmem:[#allocation2 + $0x120] sm:$0xff]  ;;  %v76_v41 = vld [vmem:[#allocation2 + $0x130] sm:$0xff]  ;;  %v2439_v14 = vsub.s32 7, %v104_v1 }
  0x32   :  { %784 = vmatpush1.msra.mxu0 %v50_v16  ;;  %847 = vmatprep.mubr.f32.mxu0 %v2266_v0  ;;  %v79_v42 = vld [vmem:[#allocation2 + $0x148] sm:$0xff]  ;;  %v81_v43 = vld [vmem:[#allocation2 + $0x158] sm:$0xff]  ;;  %v78_v44 = vld [vmem:[#allocation2 + $0x140] sm:$0xff] }
  0x33   :  { %855 = vmatpush1.msra.mxu1 %v52_v17  ;;  %918 = vmatprep.mubr.f32.mxu1 %v2266_v0  ;;  %v80_v45 = vld [vmem:[#allocation2 + $0x150] sm:$0xff]  ;;  %v83_v46 = vld [vmem:[#allocation2 + $0x168] sm:$0xff]  ;;  %v85_v47 = vld [vmem:[#allocation2 + $0x178] sm:$0xff] }
  0x34   :  { %2194 = vmatmul.mubr.msk.f32.vlgmr.msra.gmra.mrb[6].mxu0 %vm353_vm0, %v2316_v5  ;;  %2195 = vmatmul.mubr.msk.f32.vlgmr.msra.gmra.mrb[6].mxu1 %vm353_vm0, %v2316_v5  ;;  %v82_v48 = vld [vmem:[#allocation2 + $0x160] sm:$0xff]  ;;  %v84_v49 = vld [vmem:[#allocation2 + $0x170] sm:$0xff]  ;;  %v87_v50 = vld [vmem:[#allocation2 + $0x188] sm:$0xff] }
  0x35   :  { %925 = vmatprep.subr.mxu0 %v55_v18  ;;  %996 = vmatprep.subr.mxu1 %v57_v19  ;;  %v86_v51 = vld [vmem:[#allocation2 + $0x180] sm:$0xff]  ;;  %v2429_v9 = vld [vmem:[#allocation4] sm:$0xff]  ;;  %v2445_v17 = vld [vmem:[#allocation4 + $0x8] sm:$0xff] }
  0x36   :  { %926 = vmatpush1.msra.mxu0 %v54_v20  ;;  %989 = vmatprep.mubr.f32.mxu0 %v2266_v0  ;;  %v106_v20 = vrot.slane %v2429_v9, %v2423_v6 }
  0x37   :  { %997 = vmatpush1.msra.mxu1 %v56_v21  ;;  %1060 = vmatprep.mubr.f32.mxu1 %v2266_v0  ;;  %v110_v21 = vrot.slane %v2429_v9, %v2425_v7 }
  0x38   :  { %2196 = vmatmul.mubr.msk.f32.vlgmr.msra.gmra.mrb[8].mxu0 %vm353_vm0, %v2316_v5  ;;  %2197 = vmatmul.mubr.msk.f32.vlgmr.msra.gmra.mrb[8].mxu1 %vm353_vm0, %v2316_v5 }
  0x39   :  { %1067 = vmatprep.subr.mxu0 %v59_v22  ;;  %1138 = vmatprep.subr.mxu1 %v61_v23  ;;  %v114_v22 = vrot.slane %v2429_v9, %v2427_v8  ;;  %v2457_v23 = vld [vmem:[#allocation4 + $0x18] sm:$0xff] }
  0x3a   :  { %1068 = vmatpush1.msra.mxu0 %v58_v24  ;;  %1131 = vmatprep.mubr.f32.mxu0 %v2266_v0  ;;  %v122_v24 = vrot.slane %v2429_v9, %v2431_v10  ;;  %v218_v1 = vrot.slane %v2457_v23, %v2431_v10 }
  0x3b   :  { %1139 = vmatpush1.msra.mxu1 %v60_v25  ;;  %1202 = vmatprep.mubr.f32.mxu1 %v2266_v0  ;;  %v118_v25 = vrot.slane %v2429_v9, %v2433_v11 }
  0x3c   :  { %2198 = vmatmul.mubr.msk.f32.vlgmr.msra.gmra.mrb[10].mxu0 %vm353_vm0, %v2316_v5  ;;  %2199 = vmatmul.mubr.msk.f32.vlgmr.msra.gmra.mrb[10].mxu1 %vm353_vm0, %v2316_v5 }
  0x3d   :  { %1209 = vmatprep.subr.mxu0 %v63_v26  ;;  %1280 = vmatprep.subr.mxu1 %v65_v27  ;;  %v126_v26 = vrot.slane %v2429_v9, %v2435_v12  ;;  %v130_v27 = vrot.slane %v2429_v9, %v2437_v13 }
  0x3e   :  { %1210 = vmatpush1.msra.mxu0 %v62_v28  ;;  %1273 = vmatprep.mubr.f32.mxu0 %v2266_v0  ;;  %v2467_v28 = vld [vmem:[#allocation4 + $0x10] sm:$0xff] }
  0x3f   :  { %1281 = vmatpush1.msra.mxu1 %v64_v29  ;;  %1344 = vmatprep.mubr.f32.mxu1 %v2266_v0  ;;  %v194_v29 = vrot.slane %v2467_v28, %v2437_v13 }
  0x40   :  { %2200 = vmatmul.mubr.msk.f32.vlgmr.msra.gmra.mrb[12].mxu0 %vm353_vm0, %v2316_v5  ;;  %2201 = vmatmul.mubr.msk.f32.vlgmr.msra.gmra.mrb[12].mxu1 %vm353_vm0, %v2316_v5 }
  0x41   :  { %1351 = vmatprep.subr.mxu0 %v67_v30  ;;  %1422 = vmatprep.subr.mxu1 %v69_v31 }
  0x42   :  { %1352 = vmatpush1.msra.mxu0 %v66_v32  ;;  %1415 = vmatprep.mubr.f32.mxu0 %v2266_v0 }
  0x43   :  { %1423 = vmatpush1.msra.mxu1 %v68_v33  ;;  %1486 = vmatprep.mubr.f32.mxu1 %v2266_v0 }
  0x44   :  { %2202 = vmatmul.mubr.msk.f32.vlgmr.msra.gmra.mrb[14].mxu0 %vm353_vm0, %v2316_v5  ;;  %2203 = vmatmul.mubr.msk.f32.vlgmr.msra.gmra.mrb[14].mxu1 %vm353_vm0, %v2316_v5 }
  0x45   :  { %1493 = vmatprep.subr.mxu0 %v71_v34  ;;  %1564 = vmatprep.subr.mxu1 %v73_v35 }
  0x46   :  { %1494 = vmatpush1.msra.mxu0 %v70_v36  ;;  %1557 = vmatprep.mubr.f32.mxu0 %v2266_v0 }
  0x47   :  { %1565 = vmatpush1.msra.mxu1 %v72_v37  ;;  %1628 = vmatprep.mubr.f32.mxu1 %v2266_v0 }
  0x48   :  { %2204 = vmatmul.mubr.msk.f32.vlgmr.msra.gmra.mrb[16].mxu0 %vm353_vm0, %v2316_v5  ;;  %2205 = vmatmul.mubr.msk.f32.vlgmr.msra.gmra.mrb[16].mxu1 %vm353_vm0, %v2316_v5 }
  0x49   :  { %1635 = vmatprep.subr.mxu0 %v75_v38  ;;  %1706 = vmatprep.subr.mxu1 %v77_v39 }
  0x4a   :  { %1636 = vmatpush1.msra.mxu0 %v74_v40  ;;  %1699 = vmatprep.mubr.f32.mxu0 %v2266_v0  ;;  %v210_v40 = vrot.slane %v2457_v23, %v2427_v8 }
  0x4b   :  { %1707 = vmatpush1.msra.mxu1 %v76_v41  ;;  %1770 = vmatprep.mubr.f32.mxu1 %v2266_v0 }
  0x4c   :  { %2206 = vmatmul.mubr.msk.f32.vlgmr.msra.gmra.mrb[18].mxu0 %vm353_vm0, %v2316_v5  ;;  %2207 = vmatmul.mubr.msk.f32.vlgmr.msra.gmra.mrb[18].mxu1 %vm353_vm0, %v2316_v5 }
  0x4d   :  { %1777 = vmatprep.subr.mxu0 %v79_v42  ;;  %1848 = vmatprep.subr.mxu1 %v81_v43  ;;  %v206_v43 = vrot.slane %v2457_v23, %v2425_v7  ;;  %v226_v42 = vrot.slane %v2457_v23, %v2437_v13 }
  0x4e   :  { %1778 = vmatpush1.msra.mxu0 %v78_v44  ;;  %1841 = vmatprep.mubr.f32.mxu0 %v2266_v0  ;;  %v214_v44 = vrot.slane %v2457_v23, %v2433_v11 }
  0x4f   :  { %1849 = vmatpush1.msra.mxu1 %v80_v45  ;;  %1912 = vmatprep.mubr.f32.mxu1 %v2266_v0 }
  0x50   :  { %2208 = vmatmul.mubr.msk.f32.vlgmr.msra.gmra.mrb[20].mxu0 %vm353_vm0, %v2316_v5  ;;  %2209 = vmatmul.mubr.msk.f32.vlgmr.msra.gmra.mrb[20].mxu1 %vm353_vm0, %v2316_v5 }
  0x51   :  { %1919 = vmatprep.subr.mxu0 %v83_v46  ;;  %1990 = vmatprep.subr.mxu1 %v85_v47  ;;  %v2519_v46 = vld [vmem:[#allocation4 + $0x20] sm:$0xff] }
  0x52   :  { %1920 = vmatpush1.msra.mxu0 %v82_v48  ;;  %1983 = vmatprep.mubr.f32.mxu0 %v2266_v0 }
  0x53   :  { %1991 = vmatpush1.msra.mxu1 %v84_v49  ;;  %2054 = vmatprep.mubr.f32.mxu1 %v2266_v0  ;;  %v222_v49 = vrot.slane %v2457_v23, %v2435_v12 }
  0x54   :  { %2210 = vmatmul.mubr.msk.f32.vlgmr.msra.gmra.mrb[22].mxu0 %vm353_vm0, %v2316_v5  ;;  %2211 = vmatmul.mubr.msk.f32.vlgmr.msra.gmra.mrb[22].mxu1 %vm353_vm0, %v2316_v5 }
  0x55   :  { %2061 = vmatprep.subr.mxu0 %v87_v50  ;;  %2125 = vmatprep.mubr.f32.mxu0 %v2266_v0  ;;  %v230_v50 = vrot.slane %v2457_v23, %v2439_v14 }
  0x56   :  { %2062 = vmatpush1.msra.mxu0 %v86_v51 }
  0x58   :  { %2212 = vmatmul.mubr.msk.f32.vlgmr.msra.gmra.mrb[24].mxu0 %vm353_vm0, %v2316_v5 }
  0xfb   :  { %v2391_v52 = vpop.f32.mrb[0].mxu0  ;;  %v2393_v53 = vpop.f32.mrb[0].mxu1 }
  0xfc   :  { %v2395_v54 = vpop.f32.mrb[1].mxu0  ;;  %v2397_v55 = vpop.f32.mrb[1].mxu1  ;;  %v424_v35 = vadd.f32 %v2391_v52, %v106_v20  ;;  %v495_v37 = vadd.f32 %v2393_v53, %v114_v22  ;;  %v238_v52 = vrot.slane %v2519_v46, %v2425_v7  ;;  %v246_v53 = vrot.slane %v2519_v46, %v2433_v11 }
  0xfd   :  { %v426_v47 = vadd.f32 %v2395_v54, %v110_v21  ;;  %v234_v54 = vrot.slane %v2519_v46, %v2423_v6  ;;  %v242_v21 = vrot.slane %v2519_v46, %v2427_v8  ;;  %v497_v20 = vadd.f32 %v2397_v55, %v118_v25 }
  0xff   :  { %v2399_v56 = vpop.f32.mrb[2].mxu0  ;;  %v2401_v57 = vpop.f32.mrb[2].mxu1 }
 0x100   :  { %v2403_v58 = vpop.f32.mrb[3].mxu0  ;;  %v2405_v59 = vpop.f32.mrb[3].mxu1 }
 0x101   :  { %v568_v22 = vadd.f32 %v2403_v58, %v126_v26 }
 0x103   :  { %v2407_v61 = vpop.f32.mrb[4].mxu0  ;;  %v2409_v62 = vpop.f32.mrb[4].mxu1 }
 0x104   :  { %v2411_v63 = vpop.f32.mrb[5].mxu0  ;;  %v2413_v0 = vpop.f32.mrb[5].mxu1 }
 0x107   :  { %v2415_v2 = vpop.f32.mrb[6].mxu0  ;;  %v2417_v3 = vpop.f32.mrb[6].mxu1 }
 0x108   :  { %v2419_v4 = vpop.f32.mrb[7].mxu0  ;;  %v2421_v5 = vpop.f32.mrb[7].mxu1 }
 0x10b   :  { %v2441_v15 = vpop.f32.mrb[8].mxu0  ;;  %v2443_v16 = vpop.f32.mrb[8].mxu1 }
 0x10c   :  { %v2447_v18 = vpop.f32.mrb[9].mxu0  ;;  %v2449_v19 = vpop.f32.mrb[9].mxu1 }
 0x10f   :  { %v2477_v33 = vpop.f32.mrb[10].mxu0  ;;  %v2479_v34 = vpop.f32.mrb[10].mxu1 }
 0x110   :  { %v2487_v38 = vpop.f32.mrb[11].mxu0  ;;  %v2489_v39 = vpop.f32.mrb[11].mxu1 }
 0x113   :  { %v2513_v51 = vpop.f32.mrb[12].mxu0  ;;  %v1346_v60 = vpop.f32.mrb[12].mxu1 }
 0x114   :  { %2719 = vst [vmem:[#allocation8_spill] sm:$0xff] %v2513_v51  ;;  %v1347_v48 = vadd.f32 %v1346_v60, %v210_v40  ;;  %v1277_v45 = vpop.f32.mrb[13].mxu0  ;;  %v1348_v41 = vpop.f32.mrb[13].mxu1 }
 0x115   :  { %v1278_v36 = vadd.f32 %v1277_v45, %v206_v43  ;;  %v1349_v32 = vadd.f32 %v1348_v41, %v214_v44  ;;  %v262_v44 = vrot.slane %v2519_v46, %v2439_v14  ;;  %v2559_v45 = vld [vmem:[#allocation4 + $0x28] sm:$0xff] }
 0x116   :  { %v2133_v31 = vmul.f32 %v1347_v48, %v426_v47  ;;  %v2720_v47 = vrot.slane %v2429_v9, %v2439_v14 }
 0x117   :  { %v2132_v40 = vmul.f32 %v1278_v36, %v424_v35  ;;  %v2134_v60 = vmul.f32 %v1349_v32, %v495_v37  ;;  %v1417_v30 = vpop.f32.mrb[14].mxu0  ;;  %v1488_v51 = vpop.f32.mrb[14].mxu1  ;;  %v566_v36 = vadd.f32 %v2399_v56, %v122_v24  ;;  %v637_v37 = vadd.f32 %v2401_v57, %v130_v27 }
 0x118   :  { %2158 = vst [vmem:[%s2718_s3 + $0x8] sm:$0xff] %v2133_v31  ;;  %v1418_v41 = vadd.f32 %v1417_v30, %v218_v1  ;;  %v1489_v43 = vadd.f32 %v1488_v51, %v226_v42  ;;  %v1419_v35 = vpop.f32.mrb[15].mxu0  ;;  %v1490_v32 = vpop.f32.mrb[15].mxu1  ;;  %v250_v30 = vrot.slane %v2519_v46, %v2431_v10  ;;  %v258_v56 = vrot.slane %v2519_v46, %v2437_v13 }
 0x119   :  { %2157 = vst [vmem:[%s2718_s3] sm:$0xff] %v2132_v40  ;;  %2159 = vst [vmem:[%s2718_s3 + $0x10] sm:$0xff] %v2134_v60  ;;  %v1420_v55 = vadd.f32 %v1419_v35, %v222_v49  ;;  %v1491_v58 = vadd.f32 %v1490_v32, %v230_v50  ;;  %v254_v42 = vrot.slane %v2519_v46, %v2435_v12 }
 0x11a   :  { %v2135_v25 = vmul.f32 %v1418_v41, %v497_v20  ;;  %v2137_v26 = vmul.f32 %v1489_v43, %v568_v22  ;;  %v639_v48 = vadd.f32 %v2405_v59, %v2720_v47  ;;  %v2721_v49 = vrot.slane %v2445_v17, %v2425_v7 }
 0x11b   :  { %v2136_v24 = vmul.f32 %v1420_v55, %v566_v36  ;;  %v2138_v57 = vmul.f32 %v1491_v58, %v637_v37  ;;  %v1559_v27 = vpop.f32.mrb[16].mxu0  ;;  %v1630_v31 = vpop.f32.mrb[16].mxu1  ;;  %v2722_v59 = vrot.slane %v2445_v17, %v2423_v6  ;;  %v274_v41 = vrot.slane %v2559_v45, %v2427_v8 }
 0x11c   :  { %v710_v50 = vadd.f32 %v2411_v63, %v2721_v49  ;;  %2160 = vst [vmem:[%s2718_s3 + $0x18] sm:$0xff] %v2135_v25  ;;  %2162 = vst [vmem:[%s2718_s3 + $0x28] sm:$0xff] %v2137_v26  ;;  %v1560_v46 = vadd.f32 %v1559_v27, %v234_v54  ;;  %v1631_v51 = vadd.f32 %v1630_v31, %v242_v21  ;;  %v1561_v1 = vpop.f32.mrb[17].mxu0  ;;  %v1632_v40 = vpop.f32.mrb[17].mxu1 }
 0x11d   :  { %v708_v9 = vadd.f32 %v2407_v61, %v2722_v59  ;;  %v2723_v63 = vrot.slane %v2445_v17, %v2427_v8  ;;  %2161 = vst [vmem:[%s2718_s3 + $0x20] sm:$0xff] %v2136_v24  ;;  %2163 = vst [vmem:[%s2718_s3 + $0x30] sm:$0xff] %v2138_v57  ;;  %v1562_v54 = vadd.f32 %v1561_v1, %v238_v52 }
 0x11e   :  { %v1633_v21 = vadd.f32 %v1632_v40, %v246_v53  ;;  %v2139_v20 = vmul.f32 %v1560_v46, %v639_v48  ;;  %v2141_v22 = vmul.f32 %v1631_v51, %v710_v50  ;;  %v266_v61 = vrot.slane %v2559_v45, %v2423_v6 }
 0x11f   :  { %v779_v60 = vadd.f32 %v2409_v62, %v2723_v63  ;;  %v2140_v43 = vmul.f32 %v1562_v54, %v708_v9  ;;  %v1701_v35 = vpop.f32.mrb[18].mxu0  ;;  %v1772_v32 = vpop.f32.mrb[18].mxu1  ;;  %v270_v36 = vrot.slane %v2559_v45, %v2425_v7  ;;  %v278_v37 = vrot.slane %v2559_v45, %v2433_v11 }
 0x120   :  { %v2724_v52 = vrot.slane %v2445_v17, %v2433_v11  ;;  %v2725_v55 = vrot.slane %v2445_v17, %v2435_v12  ;;  %2164 = vst [vmem:[%s2718_s3 + $0x38] sm:$0xff] %v2139_v20  ;;  %2166 = vst [vmem:[%s2718_s3 + $0x48] sm:$0xff] %v2141_v22  ;;  %v1702_v25 = vadd.f32 %v1701_v35, %v250_v30  ;;  %v1703_v24 = vpop.f32.mrb[19].mxu0  ;;  %v1774_v57 = vpop.f32.mrb[19].mxu1 }
 0x121   :  { %v2142_v62 = vmul.f32 %v1633_v21, %v779_v60  ;;  %v1773_v26 = vadd.f32 %v1772_v32, %v258_v56  ;;  %2165 = vst [vmem:[%s2718_s3 + $0x40] sm:$0xff] %v2140_v43  ;;  %v1704_v30 = vadd.f32 %v1703_v24, %v254_v42  ;;  %v1775_v56 = vadd.f32 %v1774_v57, %v262_v44 }
 0x122   :  { %v781_v53 = vadd.f32 %v2413_v0, %v2724_v52  ;;  %v852_v58 = vadd.f32 %v2419_v4, %v2725_v55  ;;  %v2726_v0 = vrot.slane %v2445_v17, %v2431_v10  ;;  %v2727_v4 = vrot.slane %v2445_v17, %v2437_v13 }
 0x123   :  { %2167 = vst [vmem:[%s2718_s3 + $0x50] sm:$0xff] %v2142_v62  ;;  %v290_v49 = vrot.slane %v2559_v45, %v2437_v13  ;;  %v1843_v46 = vpop.f32.mrb[20].mxu0  ;;  %v1914_v51 = vpop.f32.mrb[20].mxu1  ;;  %v286_v1 = vrot.slane %v2559_v45, %v2435_v12  ;;  %v294_v40 = vrot.slane %v2559_v45, %v2439_v14  ;;  %v2728_v42 = vrot.slane %v2445_v17, %v2439_v14  ;;  %v94_v17 = vld [vmem:[#allocation4 + $0x30] sm:$0x3] }
 0x124   :  { %v850_v27 = vadd.f32 %v2415_v2, %v2726_v0  ;;  %v921_v31 = vadd.f32 %v2417_v3, %v2727_v4  ;;  %v2143_v47 = vmul.f32 %v1702_v25, %v781_v53  ;;  %v2145_v48 = vmul.f32 %v1773_v26, %v852_v58  ;;  %v1845_v60 = vpop.f32.mrb[21].mxu0  ;;  %v1916_v54 = vpop.f32.mrb[21].mxu1 }
 0x125   :  { %v282_v2 = vrot.slane %v2559_v45, %v2431_v10  ;;  %v923_v44 = vadd.f32 %v2421_v5, %v2728_v42  ;;  %v2729_v59 = vrot.slane %v2467_v28, %v2425_v7  ;;  %v1844_v63 = vadd.f32 %v1843_v46, %v266_v61 }
 0x126   :  { %v2144_v50 = vmul.f32 %v1704_v30, %v850_v27  ;;  %v2146_v3 = vmul.f32 %v1775_v56, %v921_v31  ;;  %2168 = vst [vmem:[%s2718_s3 + $0x58] sm:$0xff] %v2143_v47  ;;  %2170 = vst [vmem:[%s2718_s3 + $0x68] sm:$0xff] %v2145_v48  ;;  %v1915_v45 = vadd.f32 %v1914_v51, %v274_v41 }
 0x127   :  { %v994_v9 = vadd.f32 %v2447_v18, %v2729_v59  ;;  %v2730_v5 = vrot.slane %v2467_v28, %v2423_v6  ;;  %v2731_v18 = vrot.slane %v2467_v28, %v2427_v8  ;;  %v1846_v22 = vadd.f32 %v1845_v60, %v270_v36  ;;  %v1985_v35 = vpop.f32.mrb[22].mxu0  ;;  %v2056_v32 = vpop.f32.mrb[22].mxu1 }
 0x128   :  { %2169 = vst [vmem:[%s2718_s3 + $0x60] sm:$0xff] %v2144_v50  ;;  %2171 = vst [vmem:[%s2718_s3 + $0x70] sm:$0xff] %v2146_v3  ;;  %v1917_v61 = vadd.f32 %v1916_v54, %v278_v37  ;;  %v198_v41 = vrot.slane %v2467_v28, %v2439_v14  ;;  %v2147_v43 = vmul.f32 %v1844_v63, %v923_v44  ;;  %v1987_v55 = vpop.f32.mrb[23].mxu0  ;;  %v2058_v58 = vpop.f32.mrb[23].mxu1 }
 0x129   :  { %v992_v21 = vadd.f32 %v2441_v15, %v2730_v5  ;;  %v1063_v20 = vadd.f32 %v2443_v16, %v2731_v18  ;;  %v202_v15 = vrot.slane %v2457_v23, %v2423_v6  ;;  %v2149_v8 = vmul.f32 %v1915_v45, %v994_v9 }
 0x12a   :  { %v298_v52 = vrot.slane %v94_v17, %v2423_v6  ;;  %v302_v53 = vrot.slane %v94_v17, %v2425_v7  ;;  %v2732_v36 = vrot.slane %v2467_v28, %v2433_v11  ;;  %v2733_v14 = vrot.slane %v2467_v28, %v2435_v12  ;;  %2172 = vst [vmem:[%s2718_s3 + $0x78] sm:$0xff] %v2147_v43 }
 0x12b   :  { %v2148_v62 = vmul.f32 %v1846_v22, %v992_v21  ;;  %v2150_v16 = vmul.f32 %v1917_v61, %v1063_v20  ;;  %2174 = vst [vmem:[%s2718_s3 + $0x88] sm:$0xff] %v2149_v8  ;;  %v1986_v6 = vadd.f32 %v1985_v35, %v282_v2  ;;  %v2057_v7 = vadd.f32 %v2056_v32, %v290_v49 }
 0x12c   :  { %v1065_v37 = vadd.f32 %v2449_v19, %v2732_v36  ;;  %v1136_v23 = vadd.f32 %v2487_v38, %v2733_v14  ;;  %v2734_v11 = vrot.slane %v2467_v28, %v2431_v10  ;;  %v1205_v12 = vadd.f32 %v2479_v34, %v194_v29  ;;  %v2735_v29 = vld [vmem:[#allocation8_spill] sm:$0xff] }
 0x12d   :  { %2173 = vst [vmem:[%s2718_s3 + $0x80] sm:$0xff] %v2148_v62  ;;  %2175 = vst [vmem:[%s2718_s3 + $0x90] sm:$0xff] %v2150_v16  ;;  %v1988_v38 = vadd.f32 %v1987_v55, %v286_v1  ;;  %v2059_v25 = vadd.f32 %v2058_v58, %v294_v40  ;;  %v1207_v0 = vadd.f32 %v2489_v39, %v198_v41 }
 0x12e   :  { %v1134_v19 = vadd.f32 %v2477_v33, %v2734_v11  ;;  %v2151_v26 = vmul.f32 %v1986_v6, %v1065_v37  ;;  %v2153_v24 = vmul.f32 %v2057_v7, %v1136_v23  ;;  %v2127_v33 = vpop.f32.mrb[24].mxu0  ;;  %v1276_v34 = vadd.f32 %v2735_v29, %v202_v15 }
 0x12f   :  { %v2154_v57 = vmul.f32 %v2059_v25, %v1205_v12  ;;  %v2128_v13 = vadd.f32 %v2127_v33, %v298_v52  ;;  %v2129_v28 = vpop.f32.mrb[25].mxu0 }
 0x130   :  { %v2152_v10 = vmul.f32 %v1988_v38, %v1134_v19  ;;  %2176 = vst [vmem:[%s2718_s3 + $0x98] sm:$0xff] %v2151_v26  ;;  %2178 = vst [vmem:[%s2718_s3 + $0xa8] sm:$0xff] %v2153_v24  ;;  %v2130_v39 = vadd.f32 %v2129_v28, %v302_v53 }
 0x131   :  { %2179 = vst [vmem:[%s2718_s3 + $0xb0] sm:$0xff] %v2154_v57  ;;  %v2155_v27 = vmul.f32 %v2128_v13, %v1207_v0 }
 0x132   :  { %2177 = vst [vmem:[%s2718_s3 + $0xa0] sm:$0xff] %v2152_v10  ;;  %v2156_v4 = vmul.f32 %v2130_v39, %v1276_v34 }
 0x133   :  { %2180 = vst [vmem:[%s2718_s3 + $0xb8] sm:$0xff] %v2155_v27 }
 0x134   :  { %2181 = vst [vmem:[%s2718_s3 + $0xc0] sm:$0xff] %v2156_v4 }
 0x135   :  { %2186 = vsyncpa [#allocation3], 1 }
 0x136   :  { %2187 = vsyncpa [#allocation5], 1 }

</bundles_post_ra>
